<compile_context>
chip_gen: v5e
topology: v5e:2x2
jax: 0.10.0
libtpu: 0.0.40
codegen_flags: <defaults>
</compile_context>

<pallas_src>
import functools

import jax
import jax.numpy as jnp
from jax import lax
from jax.experimental import pallas as pl
from jax.experimental.pallas import tpu as pltpu


_VMEM_LIMIT_BYTES = 32 * 1024 * 1024     # explicit; headroom under v7x 64 MiB phys
_TARGET_BLOCK_ELEMS = 512 * 1024         # ~2 MiB f32 per input block (x2 buffers)


def _prod(xs):
  p = 1
  for s in xs:
    p *= int(s)
  return p


# ----------------------------------------------------------------------------
# Kernel A: reduce the LAST axis of an (M, K) slab.  Grid = (M tiles, K tiles).
# ----------------------------------------------------------------------------
def _row_mean_kernel(x_ref, o_ref, acc_ref, *, inv_k, k_true, tk, cw, mask_k):
  kk = pl.program_id(1)

  @pl.when(kk == 0)
  def _():
    acc_ref[...] = jnp.zeros_like(acc_ref)

  x = x_ref[...].astype(jnp.float32)                  # (tm, tk)
  nchunks = tk // cw
  part = None
  for c in range(nchunks):                            # static, lane-aligned slices
    chunk = x[:, c * cw:(c + 1) * cw]                 # (tm, cw) -> VPU adds only
    if mask_k:                                        # traced only if a K tail exists
      col = kk * tk + c * cw + lax.broadcasted_iota(jnp.int32, chunk.shape, 1)
      chunk = jnp.where(col < k_true, chunk, 0.0)
    part = chunk if part is None else part + chunk
  acc_ref[...] += part                                # lane-dense (tm, cw) accumulator

  @pl.when(kk == pl.num_programs(1) - 1)
  def _():
    tot = jnp.sum(acc_ref[...], axis=-1, keepdims=True)   # single XLU reduce
    o_ref[...] = (tot * inv_k).astype(o_ref.dtype)


def _pick_tm(m):
  if m % 8 == 0:
    return min(256, m)
  if m <= 1024:
    return m            # block dim == full array dim is always legal
  return 256             # tail M tile: garbage rows are dropped on writeback


def _pick_tk(k, tm):
  target = max(512, (_TARGET_BLOCK_ELEMS // max(tm, 1)) // 128 * 128)
  target = min(target, 4096)
  if k % 128 == 0:
    return min(target, k)
  if k <= target:
    return k             # block dim == full array dim
  return target           # tail K tile masked in-kernel


def _pick_cw(tk):
  if tk % 512 == 0:
    return 512
  if tk % 128 == 0:
    return 128
  return tk


def _mean_last_axis(x2d, out_dtype):
  """Row means over the last axis of a 2-D (M, K) array -> (M,)."""
  m, k = (int(s) for s in x2d.shape)
  tm = _pick_tm(m)
  tk = _pick_tk(k, tm)
  cw = _pick_cw(tk)
  grid = (pl.cdiv(m, tm), pl.cdiv(k, tk))
  mask_k = (k % tk) != 0

  kern = functools.partial(_row_mean_kernel, inv_k=1.0 / float(k),
                           k_true=k, tk=tk, cw=cw, mask_k=mask_k)
  out = pl.pallas_call(
      kern,
      out_shape=jax.ShapeDtypeStruct((m, 1), out_dtype),
      grid_spec=pltpu.PrefetchScalarGridSpec(
          num_scalar_prefetch=0,
          grid=grid,
          in_specs=[pl.BlockSpec((tm, tk), lambda i, kk: (i, kk))],
          out_specs=pl.BlockSpec((tm, 1), lambda i, kk: (i, 0)),
          scratch_shapes=[pltpu.VMEM((tm, cw), jnp.float32)],
      ),
      compiler_params=pltpu.CompilerParams(
          dimension_semantics=("parallel", "arbitrary"),
          vmem_limit_bytes=_VMEM_LIMIT_BYTES),
  )(x2d)
  return out[:, 0]


# ----------------------------------------------------------------------------
# Kernel B: reduce the MIDDLE axis of an (A, R, B) slab.
# Grid = (A, B tiles, R tiles); last dim stays lane-dense, no transpose needed.
# ----------------------------------------------------------------------------
def _mid_mean_kernel(x_ref, o_ref, acc_ref, *, inv_r, r_true, tr, mask_r):
  rr = pl.program_id(2)

  @pl.when(rr == 0)
  def _():
    acc_ref[...] = jnp.zeros_like(acc_ref)

  x = x_ref[...].astype(jnp.float32)                  # (1, tr, tb)
  if mask_r:                                          # traced only if an R tail exists
    row = rr * tr + lax.broadcasted_iota(jnp.int32, x.shape, 1)
    x = jnp.where(row < r_true, x, 0.0)
  acc_ref[...] += x                                   # elementwise VPU accumulation

  @pl.when(rr == pl.num_programs(2) - 1)
  def _():
    tot = jnp.sum(acc_ref[...], axis=1, keepdims=True)    # one sublane reduce
    o_ref[...] = (tot * inv_r).astype(o_ref.dtype)


def _pick_tr(r):
  if r % 8 == 0:
    return min(128, r)
  if r <= 1024:
    return r
  return 128


def _pick_tb(b, tr):
  target = max(512, (_TARGET_BLOCK_ELEMS // max(tr, 1)) // 128 * 128)
  target = min(target, 4096)
  if b % 128 == 0:
    return min(target, b)
  if b <= target:
    return b
  return target


def _mean_mid_axis(x3d, out_dtype):
  """Mean over the middle axis of an (A, R, B) array -> (A, B)."""
  a, r, b = (int(s) for s in x3d.shape)
  tr = _pick_tr(r)
  tb = _pick_tb(b, tr)
  grid = (a, pl.cdiv(b, tb), pl.cdiv(r, tr))
  mask_r = (r % tr) != 0

  kern = functools.partial(_mid_mean_kernel, inv_r=1.0 / float(r),
                           r_true=r, tr=tr, mask_r=mask_r)
  out = pl.pallas_call(
      kern,
      out_shape=jax.ShapeDtypeStruct((a, 1, b), out_dtype),
      grid_spec=pltpu.PrefetchScalarGridSpec(
          num_scalar_prefetch=0,
          grid=grid,
          in_specs=[pl.BlockSpec((1, tr, tb), lambda ai, bi, ri: (ai, ri, bi))],
          out_specs=pl.BlockSpec((1, 1, tb), lambda ai, bi, ri: (ai, 0, bi)),
          scratch_shapes=[pltpu.VMEM((1, tr, tb), jnp.float32)],
      ),
      compiler_params=pltpu.CompilerParams(
          dimension_semantics=("parallel", "parallel", "arbitrary"),
          vmem_limit_bytes=_VMEM_LIMIT_BYTES),
  )(x3d)
  return out.reshape(a, b)


# ----------------------------------------------------------------------------
# Public wrapper: deephi_Mean.forward (fp32 path).
# ----------------------------------------------------------------------------
def deephi_mean(x, dim=None, keepdim=False):
  x = jnp.asarray(x)
  ndim = x.ndim
  dtype = x.dtype

  # dim is None -> torch.mean(input): global 0-d mean (keepdim is ignored).
  if dim is None:
    n = int(x.size)
    if n == 0:
      return jnp.array(jnp.nan, dtype=dtype)          # torch.mean(empty) == nan
    if ndim == 0:
      return x
    # Free reshape of the contiguous buffer to a lane-dense 2-D slab.
    k2 = None
    for cand in (4096, 2048, 1024, 512, 256, 128):
      if n % cand == 0:
        k2 = cand
        break
    if k2 is None:
      k2 = int(x.shape[-1])                           # natural (still free) fallback
    m2 = n // k2
    row_means = _mean_last_axis(x.reshape(m2, k2), dtype)     # (m2,)
    # Every row has identical length -> mean of row-means == global mean.
    return jnp.mean(row_means.astype(jnp.float32)).astype(dtype).reshape(())

  # Explicit reduction axes.
  dims = (dim,) if isinstance(dim, int) else tuple(dim)
  dims = tuple(sorted({d % ndim for d in dims}))
  keep_axes = tuple(a for a in range(ndim) if a not in dims)
  kept_shape = tuple(int(x.shape[a]) for a in keep_axes)
  red_size = _prod(x.shape[a] for a in dims)
  if keepdim:
    out_shape = tuple(1 if a in dims else int(x.shape[a]) for a in range(ndim))
  else:
    out_shape = kept_shape

  if red_size == 0:
    return jnp.full(out_shape, jnp.nan, dtype=dtype)  # mean over an empty extent
  if _prod(kept_shape) == 0:
    return jnp.zeros(out_shape, dtype=dtype)          # empty output

  contiguous = dims == tuple(range(dims[0], dims[-1] + 1))

  if contiguous and dims[-1] == ndim - 1:
    # Trailing block of axes: free reshape to (M, K), reduce K.
    m = _prod(x.shape[:dims[0]])
    res = _mean_last_axis(x.reshape(m, red_size), dtype)       # (M,)
    return res.reshape(out_shape)

  if contiguous:
    # Inner block of axes (e.g. dim=1 in NCHW): free reshape to (A, R, B),
    # reduce the middle axis directly -- no transpose pass over HBM.
    a = _prod(x.shape[:dims[0]])
    b = _prod(x.shape[dims[-1] + 1:])
    res = _mean_mid_axis(x.reshape(a, red_size, b), dtype)     # (A, B)
    return res.reshape(out_shape)

  # Non-contiguous reduced axes (rare): one relayout pass, then kernel A.
  # TODO(synk): fuse the relayout into the kernel for non-contiguous dims.
  xt = jnp.transpose(x, keep_axes + dims)
  m = _prod(kept_shape)
  res = _mean_last_axis(xt.reshape(m, red_size), dtype)
  return res.reshape(out_shape)


if __name__ == "__main__":
  key = jax.random.PRNGKey(0)
  x = jax.random.normal(key, (2, 4, 16, 16), dtype=jnp.float32)  # NCHW

  # Case 1: spatial mean with keepdim (global-average-pool pattern).
  y1 = deephi_mean(x, dim=(2, 3), keepdim=True)
  jax.block_until_ready(y1)
  ref1 = jnp.mean(x, axis=(2, 3), keepdims=True)
  assert y1.shape == (2, 4, 1, 1)
  assert jnp.allclose(y1, ref1, atol=1e-5, rtol=1e-5)

  # Case 2: single non-trailing axis, keepdim=False (middle-axis kernel, no transpose).
  y2 = deephi_mean(x, dim=1, keepdim=False)
  jax.block_until_ready(y2)
  ref2 = jnp.mean(x, axis=1)
  assert y2.shape == (2, 16, 16)
  assert jnp.allclose(y2, ref2, atol=1e-5, rtol=1e-5)

  # Case 3: dim=None -> global scalar mean.
  y3 = deephi_mean(x, dim=None)
  jax.block_until_ready(y3)
  ref3 = jnp.mean(x)
  assert y3.shape == ()
  assert jnp.allclose(y3, ref3, atol=1e-5, rtol=1e-5)

  print("KERNEL_OK")
</pallas_src>

<mosaic_0001>
module attributes {stable_mosaic.version = 11 : i64} {
  func.func @_row_mean_kernel(%arg0: i32, %arg1: i32, %arg2: memref<8x256xf32, #tpu.memory_space<vmem>>, %arg3: memref<8x1xf32, #tpu.memory_space<vmem>>, %arg4: memref<8x128xf32, #tpu.memory_space<vmem>>) attributes {dimension_semantics = [#tpu.dimension_semantics<parallel>, #tpu.dimension_semantics<arbitrary>], iteration_bounds = array<i64: 1, 1>, scalar_prefetch = 0 : i64, scratch_operands = 1 : i64, tpu.core_type = #tpu.core_type<tc>, window_params = [{transform_indices = @transform_0, window_bounds = array<i64: 8, 256>}, {transform_indices = @transform_1, window_bounds = array<i64: 8, 1>}]} {
    %c0_i32 = arith.constant 0 : i32
    %0 = arith.cmpi eq, %arg1, %c0_i32 : i32
    %1 = arith.extui %0 : i1 to i32
    %c0_i32_0 = arith.constant 0 : i32
    %2 = arith.cmpi ne, %1, %c0_i32_0 : i32
    scf.if %2 {
      %cst = arith.constant 0.000000e+00 : f32
      %13 = vector.broadcast %cst : f32 to vector<8x128xf32>
      %c0_8 = arith.constant 0 : index
      %c0_9 = arith.constant 0 : index
      %14 = vector.load %arg4[%c0_8, %c0_9] : memref<8x128xf32, #tpu.memory_space<vmem>>, vector<8x128xf32>
      tpu.vector_store %arg4[%c0_8, %c0_9], %13 {strides = array<i32>} : memref<8x128xf32, #tpu.memory_space<vmem>>, vector<8x128xf32>,
    } else {
    }
    %c0 = arith.constant 0 : index
    %c0_1 = arith.constant 0 : index
    %3 = vector.load %arg2[%c0, %c0_1] : memref<8x256xf32, #tpu.memory_space<vmem>>, vector<8x256xf32>
    %4 = vector.extract_strided_slice %3 {offsets = [0, 0], sizes = [8, 128], strides = [1, 1]} : vector<8x256xf32> to vector<8x128xf32>
    %5 = vector.extract_strided_slice %3 {offsets = [0, 128], sizes = [8, 128], strides = [1, 1]} : vector<8x256xf32> to vector<8x128xf32>
    %6 = arith.addf %4, %5 : vector<8x128xf32>
    %c0_2 = arith.constant 0 : index
    %c0_3 = arith.constant 0 : index
    %7 = vector.load %arg4[%c0_2, %c0_3] : memref<8x128xf32, #tpu.memory_space<vmem>>, vector<8x128xf32>
    %8 = arith.addf %7, %6 : vector<8x128xf32>
    %c0_4 = arith.constant 0 : index
    %c0_5 = arith.constant 0 : index
    %9 = vector.load %arg4[%c0_4, %c0_5] : memref<8x128xf32, #tpu.memory_space<vmem>>, vector<8x128xf32>
    tpu.vector_store %arg4[%c0_4, %c0_5], %8 {strides = array<i32>} : memref<8x128xf32, #tpu.memory_space<vmem>>, vector<8x128xf32>,
    %c0_i32_6 = arith.constant 0 : i32
    %10 = arith.cmpi eq, %arg1, %c0_i32_6 : i32
    %11 = arith.extui %10 : i1 to i32
    %c0_i32_7 = arith.constant 0 : i32
    %12 = arith.cmpi ne, %11, %c0_i32_7 : i32
    scf.if %12 {
      %c0_8 = arith.constant 0 : index
      %c0_9 = arith.constant 0 : index
      %13 = vector.load %arg4[%c0_8, %c0_9] : memref<8x128xf32, #tpu.memory_space<vmem>>, vector<8x128xf32>
      %cst = arith.constant dense<0.000000e+00> : vector<8xf32>
      %14 = vector.multi_reduction <add>, %13, %cst [1] : vector<8x128xf32> to vector<8xf32>
      %15 = vector.shape_cast %14 : vector<8xf32> to vector<8x1xf32>
      %cst_10 = arith.constant 3.906250e-03 : f32
      %16 = vector.broadcast %cst_10 : f32 to vector<8x1xf32>
      %17 = arith.mulf %15, %16 : vector<8x1xf32>
      %c0_11 = arith.constant 0 : index
      %c0_12 = arith.constant 0 : index
      %18 = vector.load %arg3[%c0_11, %c0_12] : memref<8x1xf32, #tpu.memory_space<vmem>>, vector<8x1xf32>
      tpu.vector_store %arg3[%c0_11, %c0_12], %17 {strides = array<i32>} : memref<8x1xf32, #tpu.memory_space<vmem>>, vector<8x1xf32>,
    } else {
    }
    return
  }
  func.func @transform_0(%arg0: i32, %arg1: i32) -> (i32, i32) {
    %c0_i32 = arith.constant 0 : i32
    return %arg0, %arg1 : i32, i32
  }
  func.func @transform_1(%arg0: i32, %arg1: i32) -> (i32, i32) {
    %c0_i32 = arith.constant 0 : i32
    %c0_i32_0 = arith.constant 0 : i32
    return %arg0, %c0_i32 : i32, i32
  }
}

</mosaic_0001>

<bundles_post_ra>
// kernel: tpu_custom_call.1
= control target key start
LH: loop header
LB: loop body
LE: loop exit
PB: predicated region body
PF: predicated region fallthrough
CT: control target
= control target key end

     0   :  { %6 = vsyncpa [#allocation4], 0  ;;  %s74_s9 = smov [#allocation3]   ;;  %s91_s0 = inlined_call_operand.hbm [shape: f32[8,256], index: 0, kind: input, shape index: {}]   ;;  %s92_s1 = inlined_call_operand.vmem [shape: f32[8,1], index: 1, kind: output, shape index: {}]  }
   0x1   :  { %s12_s8 = sshll.u32 %s91_s0, 4  ;;  %s14_s10 = sshll.u32 %s74_s9, 4  ;;  %s13_s8 = int_to_ptr.hbm [resolvable:$true] %s12_s8  ;;  %s15_s10 = int_to_ptr.vmem [resolvable:$true] %s14_s10 }
   0x2   :  { %17 = dma.hbm_to_vmem [thread:$0]  %s13_s8, 256, %s15_s10, [#allocation4]  }
   0x3   :  { %72 = dma.done.wait [#allocation4], 256  }
   0x4   :  { %73 = vsyncadd [#allocation4], 4294967040  ;;  %v27_v0 = vld [vmem:[#allocation3] sm:$0xff]  ;;  %v28_v1 = vld [vmem:[#allocation3 + $0x8] sm:$0xff]  ;;  %vm40_vm0 = vcmask 7168  }
   0x5   :  { %v29_v2 = vadd.f32 %v28_v1, %v27_v0 }
   0x7   :  { %37 = vadd.xlane.f32.xlu0 %v29_v2 }
  0x7a   :  { %v38_v3 = vpop.xlane.xlu0 %37 }
  0x7b   :  { %v39_v4 = vmul.f32 0.00390625, %v38_v3 }
  0x7d   :  { %41 = vst.msk [vmem:[%s92_s1] sm:$0xff] %vm40_vm0, %v39_v4 }
  0x7e   :  { %46 = vsyncpa [#allocation4], 1 }

</bundles_post_ra>
